<compile_context>
chip_gen: v6e
topology: v6e:2x2x1
jax: 0.10.0
libtpu: 0.0.40
codegen_flags: <defaults>
</compile_context>

<pallas_src>
import jax
import jax.numpy as jnp
from jax.experimental import pallas as pl
from jax.experimental.pallas import tpu as pltpu


def nfm_kernel(first_ref, s_ref, sq_ref, w1_ref, b1_ref, w2_ref, b2_ref,
               bias_ref, out_ref):
    # FM first order (already summed over fields in the glue) + global bias.
    fm_first = first_ref[...] + bias_ref[0]                        # (TB, 1)

    # FM second-order interaction: 0.5 * ((sum_f e_f)^2 - sum_f e_f^2),
    # with the field sums precomputed in the gather glue.
    s = s_ref[...]                                                 # (TB, E)
    second = 0.5 * (s * s - sq_ref[...])                           # (TB, E)

    # Hidden layer 1: K = E (= 4) is far below the MXU contraction depth,
    # so compute it as E VPU broadcast-FMA terms (frees the MXU slot).
    w1 = w1_ref[...]                                               # (E, H)
    acc = second[:, 0:1] * w1[0:1, :] + b1_ref[...]                # (TB, H)
    for k in range(1, w1.shape[0]):                                # unrolled, E small/static
        acc = acc + second[:, k:k + 1] * w1[k:k + 1, :]
    h = jnp.maximum(acc, 0.0)

    # Hidden layer 2 on the MXU (K = H).
    h = jnp.dot(h, w2_ref[...], preferred_element_type=jnp.float32) + b2_ref[...]
    h = jnp.maximum(h, 0.0)                                        # (TB, H)

    out_ref[...] = fm_first + jnp.sum(h, axis=1, keepdims=True)    # (TB, 1)


def _round_up(x, m):
    return (x + m - 1) // m * m


def prepare_fused_params(params):
    """Concatenate the ragged per-field tables into single tables + offsets."""
    first_table = jnp.concatenate(params["first_emb"], axis=0)      # (V_total, 1)
    second_table = jnp.concatenate(params["second_emb"], axis=0)    # (V_total, E)
    sizes = jnp.array([t.shape[0] for t in params["first_emb"]], jnp.int32)
    offsets = jnp.concatenate(
        [jnp.zeros((1,), jnp.int32), jnp.cumsum(sizes)[:-1].astype(jnp.int32)]
    )
    return {
        "first_table": first_table,
        "second_table": second_table,
        "offsets": offsets,
        "w1": params["w1"], "b1": params["b1"],
        "w2": params["w2"], "b2": params["b2"],
        "bias": params["bias"],
    }


def nfm_pallas_forward(fused, Xi, Xv, *, block_b=512):
    """Xi: (B, F) int32 indices, Xv: (B, F) float32 values. Returns (B,) float32."""
    B, F = Xi.shape
    E = fused["second_table"].shape[1]
    H = fused["w1"].shape[1]

    # --- glue: ONE fused gather over concatenated tables + field reductions ---
    gidx = Xi.astype(jnp.int32) + fused["offsets"][None, :]                # (B, F)
    first = jnp.take(fused["first_table"][:, 0], gidx, axis=0) * Xv        # (B, F)
    e2 = jnp.take(fused["second_table"], gidx, axis=0) * Xv[:, :, None]    # (B, F, E), fused by XLA

    first_sum = jnp.sum(first, axis=1, keepdims=True).astype(jnp.float32)  # (B, 1)
    s = jnp.sum(e2, axis=1).astype(jnp.float32)                            # (B, E)
    sq = jnp.sum(e2 * e2, axis=1).astype(jnp.float32)                      # (B, E)

    # --- batch tiling (TB multiple of 8, capped so VMEM stays tiny on v7x too) ---
    tb = min(block_b, _round_up(B, 8))
    Bp = _round_up(B, tb)
    if Bp != B:
        pad = ((0, Bp - B), (0, 0))
        first_sum = jnp.pad(first_sum, pad)
        s = jnp.pad(s, pad)
        sq = jnp.pad(sq, pad)

    grid = (Bp // tb,)

    def batch_spec(d):
        return pl.BlockSpec((tb, d), lambda i: (i, 0))

    def const_spec(shape):
        return pl.BlockSpec(shape, lambda i: (0, 0))    # weights stay resident

    out = pl.pallas_call(
        nfm_kernel,
        out_shape=jax.ShapeDtypeStruct((Bp, 1), jnp.float32),
        grid=grid,
        in_specs=[
            batch_spec(1),                                  # first_sum
            batch_spec(E),                                  # s
            batch_spec(E),                                  # sq
            const_spec((E, H)),                             # w1
            const_spec((1, H)),                             # b1
            const_spec((H, H)),                             # w2
            const_spec((1, H)),                             # b2
            pl.BlockSpec(memory_space=pltpu.MemorySpace.SMEM),  # scalar bias
        ],
        out_specs=batch_spec(1),
        compiler_params=pltpu.CompilerParams(
            dimension_semantics=("parallel",),              # megacore shard on v7x
        ),
    )(first_sum, s, sq, fused["w1"], fused["b1"], fused["w2"], fused["b2"],
      fused["bias"])

    return out[:B, 0]


def nfm_reference(params, Xi, Xv):
    """Pure-JAX reference mirroring the PyTorch forward() (per-field gathers)."""
    F = Xi.shape[1]
    first_vals = jnp.stack(
        [params["first_emb"][f][Xi[:, f], 0] * Xv[:, f] for f in range(F)], axis=1
    )
    fm_first = jnp.sum(first_vals, axis=1) + params["bias"][0]
    emb2 = jnp.stack(
        [params["second_emb"][f][Xi[:, f], :] * Xv[:, f][:, None] for f in range(F)],
        axis=1,
    )
    s = jnp.sum(emb2, axis=1)
    sq = jnp.sum(emb2 * emb2, axis=1)
    second = 0.5 * (s * s - sq)
    h = jnp.maximum(second @ params["w1"] + params["b1"], 0.0)
    h = jnp.maximum(h @ params["w2"] + params["b2"], 0.0)
    return fm_first + jnp.sum(h, axis=1)


def init_params(key, feature_sizes, embedding_size, hidden, b=0.99):
    """Deterministic parameter init (shapes follow the PyTorch __init__)."""
    keys = jax.random.split(key, 2 * len(feature_sizes) + 4)
    k_iter = iter(keys)
    first_emb = [
        jax.random.normal(next(k_iter), (fs, 1), jnp.float32) for fs in feature_sizes
    ]
    second_emb = [
        jax.random.normal(next(k_iter), (fs, embedding_size), jnp.float32)
        for fs in feature_sizes
    ]
    # nn.Linear default init: U(-1/sqrt(fan_in), 1/sqrt(fan_in)); stored as (in, out)
    lim1 = 1.0 / jnp.sqrt(embedding_size)
    w1 = jax.random.uniform(next(k_iter), (embedding_size, hidden), jnp.float32, -lim1, lim1)
    b1 = jax.random.uniform(next(k_iter), (1, hidden), jnp.float32, -lim1, lim1)
    lim2 = 1.0 / jnp.sqrt(hidden)
    w2 = jax.random.uniform(next(k_iter), (hidden, hidden), jnp.float32, -lim2, lim2)
    b2 = jax.random.uniform(next(k_iter), (1, hidden), jnp.float32, -lim2, lim2)
    return {
        "first_emb": first_emb,
        "second_emb": second_emb,
        "w1": w1,
        "b1": b1,
        "w2": w2,
        "b2": b2,
        "bias": jnp.array([b], jnp.float32),
    }


if __name__ == "__main__":
    # Small, forward-consistent shapes.
    feature_sizes = [10, 20, 15, 8, 12]   # field_size F = 5
    embedding_size = 4
    hidden = 32
    B = 8
    F = len(feature_sizes)

    key = jax.random.PRNGKey(0)
    kp, kxi, kxv = jax.random.split(key, 3)

    params = init_params(kp, feature_sizes, embedding_size, hidden)
    fused = prepare_fused_params(params)

    # Xi: per-field categorical indices, Xv: per-field values.
    xi_cols = []
    ki = jax.random.split(kxi, F)
    for f, fs in enumerate(feature_sizes):
        xi_cols.append(jax.random.randint(ki[f], (B,), 0, fs, dtype=jnp.int32))
    Xi = jnp.stack(xi_cols, axis=1)                      # (B, F) int32
    Xv = jax.random.uniform(kxv, (B, F), jnp.float32)    # (B, F) f32

    out = nfm_pallas_forward(fused, Xi, Xv)
    out = jax.block_until_ready(out)

    ref = nfm_reference(params, Xi, Xv)
    assert out.shape == (B,)
    assert jnp.allclose(out, ref, atol=1e-4, rtol=1e-4), (out, ref)

    # TODO(synk): training-side methods (fit/update_embedding with Adam) are not
    # part of the forward pass and are not implemented.
    print("KERNEL_OK")
</pallas_src>

<mosaic_0001>
module attributes {stable_mosaic.version = 11 : i64} {
  func.func @nfm_kernel(%arg0: i32, %arg1: memref<8x1xf32, #tpu.memory_space<vmem>>, %arg2: memref<8x4xf32, #tpu.memory_space<vmem>>, %arg3: memref<8x4xf32, #tpu.memory_space<vmem>>, %arg4: memref<4x32xf32, #tpu.memory_space<vmem>>, %arg5: memref<1x32xf32, #tpu.memory_space<vmem>>, %arg6: memref<32x32xf32, #tpu.memory_space<vmem>>, %arg7: memref<1x32xf32, #tpu.memory_space<vmem>>, %arg8: memref<1xf32, #tpu.memory_space<smem>>, %arg9: memref<8x1xf32, #tpu.memory_space<vmem>>) attributes {dimension_semantics = [#tpu.dimension_semantics<parallel>], iteration_bounds = array<i64: 1>, scalar_prefetch = 0 : i64, scratch_operands = 0 : i64, tpu.core_type = #tpu.core_type<tc>, window_params = [{transform_indices = @transform_0, window_bounds = array<i64: 8, 1>}, {transform_indices = @transform_1, window_bounds = array<i64: 8, 4>}, {transform_indices = @transform_2, window_bounds = array<i64: 8, 4>}, {pipeline_mode = #tpu.pipeline_mode<synchronous>, transform_indices = @transform_3, window_bounds = array<i64: 4, 32>}, {pipeline_mode = #tpu.pipeline_mode<synchronous>, transform_indices = @transform_4, window_bounds = array<i64: 1, 32>}, {pipeline_mode = #tpu.pipeline_mode<synchronous>, transform_indices = @transform_5, window_bounds = array<i64: 32, 32>}, {pipeline_mode = #tpu.pipeline_mode<synchronous>, transform_indices = @transform_6, window_bounds = array<i64: 1, 32>}, {transform_indices = @transform_7, window_bounds = array<i64: 1>}, {transform_indices = @transform_8, window_bounds = array<i64: 8, 1>}]} {
    %c0 = arith.constant 0 : index
    %c0_0 = arith.constant 0 : index
    %0 = vector.load %arg1[%c0, %c0_0] : memref<8x1xf32, #tpu.memory_space<vmem>>, vector<8x1xf32>
    %c0_1 = arith.constant 0 : index
    %1 = memref.load %arg8[%c0_1] : memref<1xf32, #tpu.memory_space<smem>>
    %2 = vector.broadcast %1 : f32 to vector<8x1xf32>
    %3 = arith.addf %0, %2 : vector<8x1xf32>
    %c0_2 = arith.constant 0 : index
    %c0_3 = arith.constant 0 : index
    %4 = vector.load %arg2[%c0_2, %c0_3] : memref<8x4xf32, #tpu.memory_space<vmem>>, vector<8x4xf32>
    %5 = arith.mulf %4, %4 : vector<8x4xf32>
    %c0_4 = arith.constant 0 : index
    %c0_5 = arith.constant 0 : index
    %6 = vector.load %arg3[%c0_4, %c0_5] : memref<8x4xf32, #tpu.memory_space<vmem>>, vector<8x4xf32>
    %7 = arith.subf %5, %6 : vector<8x4xf32>
    %cst = arith.constant 5.000000e-01 : f32
    %8 = vector.broadcast %cst : f32 to vector<8x4xf32>
    %9 = arith.mulf %8, %7 : vector<8x4xf32>
    %c0_6 = arith.constant 0 : index
    %c0_7 = arith.constant 0 : index
    %10 = vector.load %arg4[%c0_6, %c0_7] : memref<4x32xf32, #tpu.memory_space<vmem>>, vector<4x32xf32>
    %11 = vector.extract_strided_slice %9 {offsets = [0, 0], sizes = [8, 1], strides = [1, 1]} : vector<8x4xf32> to vector<8x1xf32>
    %12 = vector.extract_strided_slice %10 {offsets = [0, 0], sizes = [1, 32], strides = [1, 1]} : vector<4x32xf32> to vector<1x32xf32>
    %13 = vector.broadcast %11 : vector<8x1xf32> to vector<8x32xf32>
    %14 = vector.broadcast %12 : vector<1x32xf32> to vector<8x32xf32>
    %15 = arith.mulf %13, %14 : vector<8x32xf32>
    %c0_8 = arith.constant 0 : index
    %c0_9 = arith.constant 0 : index
    %16 = vector.load %arg5[%c0_8, %c0_9] : memref<1x32xf32, #tpu.memory_space<vmem>>, vector<1x32xf32>
    %17 = vector.broadcast %16 : vector<1x32xf32> to vector<8x32xf32>
    %18 = arith.addf %15, %17 : vector<8x32xf32>
    %19 = vector.extract_strided_slice %9 {offsets = [0, 1], sizes = [8, 1], strides = [1, 1]} : vector<8x4xf32> to vector<8x1xf32>
    %20 = vector.extract_strided_slice %10 {offsets = [1, 0], sizes = [1, 32], strides = [1, 1]} : vector<4x32xf32> to vector<1x32xf32>
    %21 = vector.broadcast %19 : vector<8x1xf32> to vector<8x32xf32>
    %22 = vector.broadcast %20 : vector<1x32xf32> to vector<8x32xf32>
    %23 = arith.mulf %21, %22 : vector<8x32xf32>
    %24 = arith.addf %18, %23 : vector<8x32xf32>
    %25 = vector.extract_strided_slice %9 {offsets = [0, 2], sizes = [8, 1], strides = [1, 1]} : vector<8x4xf32> to vector<8x1xf32>
    %26 = vector.extract_strided_slice %10 {offsets = [2, 0], sizes = [1, 32], strides = [1, 1]} : vector<4x32xf32> to vector<1x32xf32>
    %27 = vector.broadcast %25 : vector<8x1xf32> to vector<8x32xf32>
    %28 = vector.broadcast %26 : vector<1x32xf32> to vector<8x32xf32>
    %29 = arith.mulf %27, %28 : vector<8x32xf32>
    %30 = arith.addf %24, %29 : vector<8x32xf32>
    %31 = vector.extract_strided_slice %9 {offsets = [0, 3], sizes = [8, 1], strides = [1, 1]} : vector<8x4xf32> to vector<8x1xf32>
    %32 = vector.extract_strided_slice %10 {offsets = [3, 0], sizes = [1, 32], strides = [1, 1]} : vector<4x32xf32> to vector<1x32xf32>
    %33 = vector.broadcast %31 : vector<8x1xf32> to vector<8x32xf32>
    %34 = vector.broadcast %32 : vector<1x32xf32> to vector<8x32xf32>
    %35 = arith.mulf %33, %34 : vector<8x32xf32>
    %36 = arith.addf %30, %35 : vector<8x32xf32>
    %cst_10 = arith.constant 0.000000e+00 : f32
    %37 = vector.broadcast %cst_10 : f32 to vector<8x32xf32>
    %38 = arith.maximumf %36, %37 : vector<8x32xf32>
    %c0_11 = arith.constant 0 : index
    %c0_12 = arith.constant 0 : index
    %39 = vector.load %arg6[%c0_11, %c0_12] : memref<32x32xf32, #tpu.memory_space<vmem>>, vector<32x32xf32>
    %cst_13 = arith.constant dense<0.000000e+00> : vector<8x32xf32>
    %40 = tpu.matmul %38, %39, %cst_13 {dimension_numbers = #tpu.dot_dimension_numbers<[1], [0], [0], [1], [0, 0, 1, 1], [], []>} : vector<8x32xf32>, vector<32x32xf32>, vector<8x32xf32> -> vector<8x32xf32>
    %c0_14 = arith.constant 0 : index
    %c0_15 = arith.constant 0 : index
    %41 = vector.load %arg7[%c0_14, %c0_15] : memref<1x32xf32, #tpu.memory_space<vmem>>, vector<1x32xf32>
    %42 = vector.broadcast %41 : vector<1x32xf32> to vector<8x32xf32>
    %43 = arith.addf %40, %42 : vector<8x32xf32>
    %cst_16 = arith.constant 0.000000e+00 : f32
    %44 = vector.broadcast %cst_16 : f32 to vector<8x32xf32>
    %45 = arith.maximumf %43, %44 : vector<8x32xf32>
    %cst_17 = arith.constant dense<0.000000e+00> : vector<8xf32>
    %46 = vector.multi_reduction <add>, %45, %cst_17 [1] : vector<8x32xf32> to vector<8xf32>
    %47 = vector.shape_cast %46 : vector<8xf32> to vector<8x1xf32>
    %48 = arith.addf %3, %47 : vector<8x1xf32>
    %c0_18 = arith.constant 0 : index
    %c0_19 = arith.constant 0 : index
    %49 = vector.load %arg9[%c0_18, %c0_19] : memref<8x1xf32, #tpu.memory_space<vmem>>, vector<8x1xf32>
    tpu.vector_store %arg9[%c0_18, %c0_19], %48 {strides = array<i32>} : memref<8x1xf32, #tpu.memory_space<vmem>>, vector<8x1xf32>,
    return
  }
  func.func @transform_0(%arg0: i32) -> (i32, i32) {
    %c0_i32 = arith.constant 0 : i32
    %c0_i32_0 = arith.constant 0 : i32
    return %arg0, %c0_i32 : i32, i32
  }
  func.func @transform_1(%arg0: i32) -> (i32, i32) {
    %c0_i32 = arith.constant 0 : i32
    %c0_i32_0 = arith.constant 0 : i32
    return %arg0, %c0_i32 : i32, i32
  }
  func.func @transform_2(%arg0: i32) -> (i32, i32) {
    %c0_i32 = arith.constant 0 : i32
    %c0_i32_0 = arith.constant 0 : i32
    return %arg0, %c0_i32 : i32, i32
  }
  func.func @transform_3(%arg0: i32) -> (i32, i32) {
    %c0_i32 = arith.constant 0 : i32
    %c0_i32_0 = arith.constant 0 : i32
    %c0_i32_1 = arith.constant 0 : i32
    return %c0_i32, %c0_i32_0 : i32, i32
  }
  func.func @transform_4(%arg0: i32) -> (i32, i32) {
    %c0_i32 = arith.constant 0 : i32
    %c0_i32_0 = arith.constant 0 : i32
    %c0_i32_1 = arith.constant 0 : i32
    return %c0_i32, %c0_i32_0 : i32, i32
  }
  func.func @transform_5(%arg0: i32) -> (i32, i32) {
    %c0_i32 = arith.constant 0 : i32
    %c0_i32_0 = arith.constant 0 : i32
    %c0_i32_1 = arith.constant 0 : i32
    return %c0_i32, %c0_i32_0 : i32, i32
  }
  func.func @transform_6(%arg0: i32) -> (i32, i32) {
    %c0_i32 = arith.constant 0 : i32
    %c0_i32_0 = arith.constant 0 : i32
    %c0_i32_1 = arith.constant 0 : i32
    return %c0_i32, %c0_i32_0 : i32, i32
  }
  func.func @transform_7(%arg0: i32) -> i32 {
    %c0_i32 = arith.constant 0 : i32
    %c0_i32_0 = arith.constant 0 : i32
    return %c0_i32 : i32
  }
  func.func @transform_8(%arg0: i32) -> (i32, i32) {
    %c0_i32 = arith.constant 0 : i32
    %c0_i32_0 = arith.constant 0 : i32
    return %arg0, %c0_i32 : i32, i32
  }
}

</mosaic_0001>

<bundles_post_ra>
// kernel: tpu_custom_call.1
= control target key start
LH: loop header
LB: loop body
LE: loop exit
PB: predicated region body
PF: predicated region fallthrough
CT: control target
= control target key end

     0   :  { %v215_v0 = vmov 0   ;;  %v216_v3 = vmov 2   ;;  %v217_v7 = vmov 0.0   ;;  %v218_v9 = vmov 1   ;;  %s302_s1 = inlined_call_operand.vmem [shape: f32[8,4], index: 1, kind: input, shape index: {}]   ;;  %s303_s2 = inlined_call_operand.vmem [shape: f32[8,4], index: 2, kind: input, shape index: {}]   ;;  %s304_s5 = inlined_call_operand.vmem [shape: f32[32,32], index: 5, kind: input, shape index: {}]   ;;  %s305_s3 = inlined_call_operand.vmem [shape: f32[4,32], index: 3, kind: input, shape index: {}]   ;;  %s306_s4 = inlined_call_operand.vmem [shape: f32[1,32], index: 4, kind: input, shape index: {}]   ;;  %s307_s6 = inlined_call_operand.vmem [shape: f32[1,32], index: 6, kind: input, shape index: {}]   ;;  %s308_s7 = inlined_call_operand.<no memory space> [shape: f32[1], index: 7, kind: input, shape index: {}]   ;;  %s309_s0 = inlined_call_operand.vmem [shape: f32[8,1], index: 0, kind: input, shape index: {}]   ;;  %s310_s8 = inlined_call_operand.vmem [shape: f32[8,1], index: 8, kind: output, shape index: {}]  }
   0x1   :  { %210 = vset.pattern.permute.xlu0 %v215_v0  ;;  %v34_v1 = vld [vmem:[%s302_s1] sm:$0xff]  ;;  %212 = vset.pattern.permute.xlu1 %v216_v3  ;;  %v92_v8 = vld [vmem:[%s304_s5 + $0x18] sm:$0xff]  ;;  %v219_v10 = vmov 3   ;;  %v91_v11 = vld [vmem:[%s304_s5 + $0x10] sm:$0xff]  ;;  %vm220_vm0 = vmmov 0   ;;  %v45_v14 = vlaneseq  ;;  %vm100_vm1 = vcmask 261120  }
   0x2   :  { %v36_v2 = vld [vmem:[%s303_s2] sm:$0xff]  ;;  %v35_v4 = vmul.f32 %v34_v1, %v34_v1  ;;  %193 = vmatprep.subr.mxu0 %v217_v7  ;;  %v90_v12 = vld [vmem:[%s304_s5 + $0x8] sm:$0xff]  ;;  %201 = vmatprep.mubr.msk.f32.mxu0 %vm220_vm0, %v217_v7  ;;  %v32_v45 = vstv %s308_s7  ;;  %vm179_vm2 = vcmask 7168  }
   0x3   :  { %194 = vmatpush3.msra.mxu0 %v92_v8  ;;  %v89_v13 = vld [vmem:[%s304_s5] sm:$0xff]  ;;  %v46_v15 = vshrl.u32 %v45_v14, 7 }
   0x4   :  { %v37_v5 = vsub.f32 %v35_v4, %v36_v2  ;;  %195 = vmatprep.subr.mxu0 %v217_v7  ;;  %v39_v17 = vld [vmem:[%s305_s3] sm:$0xf] }
   0x5   :  { %196 = vmatpush3.msra.mxu0 %v91_v11  ;;  %v47_v16 = vsub.s32 0, %v46_v15  ;;  %v64_v19 = vsub.s32 1, %v46_v15  ;;  %v74_v21 = vsub.s32 2, %v46_v15  ;;  %v84_v23 = vsub.s32 3, %v46_v15  ;;  %v185_v26 = vld [vmem:[%s306_s4] ss:$0 sm:$0xff] }
   0x6   :  { %v38_v6 = vmul.f32 0.5, %v37_v5  ;;  %197 = vmatprep.subr.mxu0 %v217_v7  ;;  %v186_v39 = vld [vmem:[%s307_s6] ss:$0 sm:$0xff] }
   0x7   :  { %198 = vmatpush3.msra.mxu0 %v90_v12  ;;  %v48_v18 = vrot.slane %v39_v17, %v47_v16  ;;  %v65_v25 = vrot.slane %v39_v17, %v64_v19  ;;  %v75_v27 = vrot.slane %v39_v17, %v74_v21  ;;  %v85_v28 = vrot.slane %v39_v17, %v84_v23  ;;  %v30_v46 = vld [vmem:[%s309_s0] sm:$0xff] }
   0x8   :  { %42 = vperm.xlu0 %210, %v38_v6   ;;  %69 = vperm.xlu1 %212, %v38_v6   ;;  %v33_v47 = vadd.f32 %v32_v45, %v30_v46 }
   0x9   :  { %199 = vmatprep.subr.mxu0 %v217_v7 }
   0xa   :  { %200 = vmatpush3.msra.mxu0 %v89_v13 }
   0xc   :  { %211 = vset.pattern.permute.xlu0 %v218_v9  ;;  %213 = vset.pattern.permute.xlu1 %v219_v10 }
   0xd   :  { %59 = vperm.xlu0 %211, %v38_v6   ;;  %79 = vperm.xlu1 %213, %v38_v6  }
  0x11   :  { %214 = vset.pattern.permute.xlu0 %v219_v10 }
  0x83   :  { %v43_v20 = vpop.permute.xlu0 %42  ;;  %v70_v22 = vpop.permute.xlu1 %69 }
  0x84   :  { %v49_v24 = vmul.f32 %v48_v18, %v43_v20  ;;  %v76_v33 = vmul.f32 %v75_v27, %v70_v22 }
  0x86   :  { %v57_v31 = vadd.f32 %v185_v26, %v49_v24 }
  0x88   :  { %v60_v29 = vpop.permute.xlu0 %59  ;;  %v80_v30 = vpop.permute.xlu1 %79 }
  0x89   :  { %v66_v32 = vmul.f32 %v65_v25, %v60_v29  ;;  %v86_v35 = vmul.f32 %v85_v28, %v80_v30 }
  0x8b   :  { %v67_v34 = vadd.f32 %v66_v32, %v57_v31 }
  0x8d   :  { %v77_v36 = vadd.f32 %v76_v33, %v67_v34 }
  0x8f   :  { %v87_v37 = vadd.f32 %v86_v35, %v77_v36 }
  0x91   :  { %v88_v38 = vmax.f32 %v87_v37, 0.0 }
  0x93   :  { %202 = vmatmul.mubr.msk.f32.vlgmr.msra.gmra.mxu0 %vm100_vm1, %v88_v38 }
 0x153   :  { %v170_v40 = vpop.f32.mrf.mxu0 }
 0x154   :  { %v171_v41 = vadd.f32 %v186_v39, %v170_v40 }
 0x155   :  { %v203_v42 = vpop.f32.mrf.mxu0 }
 0x156   :  { %v174_v43 = vmax.f32 %v171_v41, 0.0 }
 0x158   :  { %v175_v44 = vsel %vm100_vm1, %v174_v43, 0.0 }
 0x159   :  { %176 = vadd.xlane.f32.xlu1 %v175_v44 }
 0x1e2   :  { %v177_v48 = vpop.xlane.xlu1 %176 }
 0x1e3   :  { %v178_v49 = vadd.f32 %v177_v48, %v33_v47 }
 0x1e5   :  { %180 = vst.msk [vmem:[%s310_s8] sm:$0xff] %vm179_vm2, %v178_v49 }

</bundles_post_ra>
